<compile_context>
chip_gen: v7x
topology: tpu7x:2x2x1
jax: 0.10.0
libtpu: 0.0.40
codegen_flags: <defaults>
</compile_context>

<pallas_src>
import functools

import jax
import jax.numpy as jnp
from jax.experimental import pallas as pl
from jax.experimental.pallas import tpu as pltpu

EPS = 1e-6
_MAX_TILE_ROWS = 1024


def rmsnorm_kernel(x_ref, w_ref, o_ref, *, hidden, apply_in_io_dtype):
    # x_ref: (TILE_ROWS, Hp), w_ref: (1, Hp) already in output dtype,
    # o_ref: (TILE_ROWS, Hp).  Padded lanes (hidden..Hp) hold zeros, so the
    # sum of squares is unaffected; divide by the true hidden size.
    x = x_ref[...]
    xf = x.astype(jnp.float32)
    ssq = jnp.sum(xf * xf, axis=-1, keepdims=True)          # f32 accumulation
    inv = jax.lax.rsqrt(ssq * (1.0 / float(hidden)) + EPS)  # EUP rsqrt slot
    if apply_in_io_dtype:
        # bf16-VPU path (v6e/v7x): no full-tile f32 `normed` temporary.
        o_ref[...] = (x * w_ref[...]) * inv.astype(o_ref.dtype)
    else:
        # f32 path (v5e / f32 inputs): matches the reference op ordering.
        o_ref[...] = w_ref[...] * (xf * inv).astype(o_ref.dtype)


def _device_kind():
    try:
        return jax.devices()[0].device_kind.lower()
    except Exception:
        return ""


def _is_v7(kind):
    return "v7" in kind


def _vmem_limit_bytes(kind):
    """Scoped-VMEM budget: ~3/4 of physical VMEM, capped at 96 MiB."""
    cap = None
    try:
        cap = getattr(pltpu.get_tpu_info(), "vmem_capacity_bytes", None)
    except Exception:
        cap = None
    if not cap:
        # Fallback keyed off the chip generation instead of the smallest chip.
        cap = (64 if _is_v7(kind) else 128) * 1024 * 1024
    return int(min(96 * 1024 * 1024, cap * 3 // 4))


def _pick_tile_rows(n_rows, hidden_padded, dtype, vmem_limit, min_steps):
    """Largest aligned row tile whose blocks + f32 temporaries fit VMEM."""
    itemsize = jnp.dtype(dtype).itemsize
    # Sublane packing: 8 rows for 32-bit, 16 for bf16/f16, 32 for int8/fp8.
    sublane = 8 * max(1, 4 // itemsize)
    row_bytes = hidden_padded * itemsize
    # 2x double-buffered input block + 2x output block, plus ~2 f32-tile-sized
    # in-kernel temporaries (the f32 upcast / x*x intermediates) per live row.
    per_row = 4 * row_bytes + 2 * 4 * hidden_padded
    budget = int(vmem_limit * 0.8)  # rest: weight block + compiler scratch
    tile = budget // per_row
    tile = min(tile, _MAX_TILE_ROWS)
    rows_aligned = pl.cdiv(n_rows, sublane) * sublane
    tile = min(tile, rows_aligned)
    if min_steps > 1:
        # Keep enough grid steps so both v7x TensorCores stream data.
        tile = min(tile, max(sublane, pl.cdiv(rows_aligned, min_steps)))
    tile = max(sublane, (tile // sublane) * sublane)
    return int(tile)


def rmsnorm(x, weight, *, tile_rows=None):
    """x: (..., H) array, weight: (H,). Returns same shape/dtype as x."""
    orig_shape = x.shape
    H = orig_shape[-1]
    x2d = x.reshape(-1, H)
    R = x2d.shape[0]

    kind = _device_kind()
    vmem_limit = _vmem_limit_bytes(kind)
    # Low-precision scale-apply only where the VPU has bf16 ALUs (v6e/v7x)
    # and the I/O dtype is actually sub-32-bit; otherwise keep f32 math.
    apply_in_io_dtype = (jnp.dtype(x.dtype).itemsize < 4) and (
        "v6" in kind or "v7" in kind)
    # v7x has 2 TensorCores per chip -> keep >= 8 grid steps for balance.
    min_steps = 8 if _is_v7(kind) else 1

    # Lane-dense output: pad H to a multiple of 128 once on the host (no-op
    # for typical 128-aligned hidden sizes).
    H_pad = H if H % 128 == 0 else int(pl.cdiv(H, 128) * 128)
    w2d = weight.reshape(1, H).astype(x.dtype)  # weight cast hoisted
    if H_pad != H:
        x2d = jnp.pad(x2d, ((0, 0), (0, H_pad - H)))
        w2d = jnp.pad(w2d, ((0, 0), (0, H_pad - H)))

    if tile_rows is None:
        tile_rows = _pick_tile_rows(R, H_pad, x.dtype, vmem_limit, min_steps)

    kernel = functools.partial(
        rmsnorm_kernel, hidden=H, apply_in_io_dtype=apply_in_io_dtype)

    out = pl.pallas_call(
        kernel,
        out_shape=jax.ShapeDtypeStruct((R, H_pad), x.dtype),
        grid_spec=pltpu.PrefetchScalarGridSpec(
            num_scalar_prefetch=0,
            # No host-side row padding: ragged last block is masked by Pallas.
            grid=(pl.cdiv(R, tile_rows),),
            in_specs=[
                pl.BlockSpec((tile_rows, H_pad), lambda i: (i, 0)),
                pl.BlockSpec((1, H_pad), lambda i: (0, 0)),  # resident weight
            ],
            out_specs=pl.BlockSpec((tile_rows, H_pad), lambda i: (i, 0)),
        ),
        compiler_params=pltpu.CompilerParams(
            dimension_semantics=("parallel",),  # shard rows across v7x TCs
            vmem_limit_bytes=vmem_limit,
        ),
    )(x2d, w2d)

    if H_pad != H:
        out = out[:, :H]
    return out.reshape(orig_shape)


def rmsnorm_ref(x, weight, eps=EPS):
    # f32-accumulating reference (matches the kernel's accumulation precision).
    xf = x.astype(jnp.float32)
    variance = jnp.mean(xf * xf, axis=-1, keepdims=True)
    normed = (xf * jax.lax.rsqrt(variance + eps)).astype(x.dtype)
    return (weight.astype(x.dtype) * normed).astype(x.dtype)


if __name__ == "__main__":
    key = jax.random.PRNGKey(0)

    # Small shape consistent with the module's forward: (batch, seq, hidden).
    batch, seq, hidden = 2, 8, 32
    x = jax.random.normal(key, (batch, seq, hidden), dtype=jnp.float32)
    # Deterministic parameter init: nn.Parameter(torch.ones(hidden_dim))
    weight = jnp.ones((hidden,), dtype=jnp.float32)

    out = jax.block_until_ready(rmsnorm(x, weight))
    ref = rmsnorm_ref(x, weight)
    assert out.shape == x.shape and out.dtype == x.dtype
    assert jnp.allclose(out, ref, atol=1e-5, rtol=1e-5), "mismatch vs reference"

    # Ragged-last-block path + non-128 H (lane-padded path): 14 rows, tile 8.
    x2 = jax.random.normal(jax.random.PRNGKey(1), (2, 7, hidden), dtype=jnp.float32)
    out2 = jax.block_until_ready(rmsnorm(x2, weight, tile_rows=8))
    ref2 = rmsnorm_ref(x2, weight)
    assert out2.shape == x2.shape and out2.dtype == x2.dtype
    assert jnp.allclose(out2, ref2, atol=1e-5, rtol=1e-5), "ragged-block mismatch"

    # bf16, 128-aligned H: exercises the low-precision scale-apply (v6e/v7x).
    hb = 128
    k0, k1 = jax.random.split(jax.random.PRNGKey(2), 2)
    xb = jax.random.normal(k0, (4, 8, hb), dtype=jnp.bfloat16)
    wb = 1.0 + 0.1 * jax.random.normal(k1, (hb,), dtype=jnp.float32)
    outb = jax.block_until_ready(rmsnorm(xb, wb))
    refb = rmsnorm_ref(xb, wb)
    assert outb.shape == xb.shape and outb.dtype == xb.dtype
    assert jnp.allclose(outb.astype(jnp.float32), refb.astype(jnp.float32),
                        atol=5e-2, rtol=5e-2), "bf16 mismatch"

    print("KERNEL_OK")
</pallas_src>

<mosaic_0001>
module attributes {stable_mosaic.version = 11 : i64} {
  func.func @rmsnorm_kernel(%arg0: i32, %arg1: memref<16x128xf32, #tpu.memory_space<vmem>>, %arg2: memref<1x128xf32, #tpu.memory_space<vmem>>, %arg3: memref<16x128xf32, #tpu.memory_space<vmem>>) attributes {dimension_semantics = [#tpu.dimension_semantics<parallel>], iteration_bounds = array<i64: 1>, scalar_prefetch = 0 : i64, scratch_operands = 0 : i64, tpu.core_type = #tpu.core_type<tc>, window_params = [{transform_indices = @transform_0, window_bounds = array<i64: 16, 128>}, {pipeline_mode = #tpu.pipeline_mode<synchronous>, transform_indices = @transform_1, window_bounds = array<i64: 1, 128>}, {transform_indices = @transform_2, window_bounds = array<i64: 16, 128>}]} {
    %c0 = arith.constant 0 : index
    %c0_0 = arith.constant 0 : index
    %0 = vector.load %arg1[%c0, %c0_0] : memref<16x128xf32, #tpu.memory_space<vmem>>, vector<16x128xf32>
    %1 = arith.mulf %0, %0 : vector<16x128xf32>
    %cst = arith.constant dense<0.000000e+00> : vector<16xf32>
    %2 = vector.multi_reduction <add>, %1, %cst [1] : vector<16x128xf32> to vector<16xf32>
    %3 = vector.shape_cast %2 : vector<16xf32> to vector<16x1xf32>
    %cst_1 = arith.constant 3.125000e-02 : f32
    %4 = vector.broadcast %cst_1 : f32 to vector<16x1xf32>
    %5 = arith.mulf %3, %4 : vector<16x1xf32>
    %cst_2 = arith.constant 9.99999997E-7 : f32
    %6 = vector.broadcast %cst_2 : f32 to vector<16x1xf32>
    %7 = arith.addf %5, %6 : vector<16x1xf32>
    %8 = math.rsqrt %7 : vector<16x1xf32>
    %c0_3 = arith.constant 0 : index
    %c0_4 = arith.constant 0 : index
    %9 = vector.load %arg2[%c0_3, %c0_4] : memref<1x128xf32, #tpu.memory_space<vmem>>, vector<1x128xf32>
    %10 = vector.broadcast %8 : vector<16x1xf32> to vector<16x128xf32>
    %11 = arith.mulf %0, %10 : vector<16x128xf32>
    %12 = vector.broadcast %9 : vector<1x128xf32> to vector<16x128xf32>
    %13 = arith.mulf %12, %11 : vector<16x128xf32>
    %c0_5 = arith.constant 0 : index
    %c0_6 = arith.constant 0 : index
    %14 = vector.load %arg3[%c0_5, %c0_6] : memref<16x128xf32, #tpu.memory_space<vmem>>, vector<16x128xf32>
    tpu.vector_store %arg3[%c0_5, %c0_6], %13 {strides = array<i32>} : memref<16x128xf32, #tpu.memory_space<vmem>>, vector<16x128xf32>,
    return
  }
  func.func @transform_0(%arg0: i32) -> (i32, i32) {
    %c0_i32 = arith.constant 0 : i32
    %c0_i32_0 = arith.constant 0 : i32
    return %arg0, %c0_i32 : i32, i32
  }
  func.func @transform_1(%arg0: i32) -> (i32, i32) {
    %c0_i32 = arith.constant 0 : i32
    %c0_i32_0 = arith.constant 0 : i32
    %c0_i32_1 = arith.constant 0 : i32
    return %c0_i32, %c0_i32_0 : i32, i32
  }
  func.func @transform_2(%arg0: i32) -> (i32, i32) {
    %c0_i32 = arith.constant 0 : i32
    %c0_i32_0 = arith.constant 0 : i32
    return %arg0, %c0_i32 : i32, i32
  }
}

</mosaic_0001>

<bundles_post_ra>
// kernel: tpu_custom_call.1
= control target key start
LH: loop header
LB: loop body
LE: loop exit
PB: predicated region body
PF: predicated region fallthrough
CT: control target
= control target key end

     0   :  { %7 = vsyncpa [#allocation3], 0  ;;  %s227_s0 = inlined_call_operand.hbm [shape: f32[16,128], index: 0, kind: input, shape index: {}]   ;;  %s228_s1 = inlined_call_operand.hbm [shape: f32[1,128], index: 1, kind: input, shape index: {}]   ;;  %s229_s2 = inlined_call_operand.hbm [shape: f32[16,128], index: 2, kind: output, shape index: {}]  }
   0x1   :  { %8 = vsyncpa [#allocation6], 0 }
   0x2   :  { %9 = vsyncpa [#allocation4], 0  ;;  %s165_s9 = smov [#allocation2]   ;;  %s93_s13 = scalar_lea.hbm %s227_s0, 256 }
   0x3   :  { %s15_s10 = sshll.u32 %s165_s9, 4  ;;  %p94_p0 = scmp.ne.s32.totalorder %s227_s0, %s93_s13  ;;  %s16_s10 = int_to_ptr.vmem [resolvable:$true] %s15_s10 }
   0x4   :  { %p97_p1 = scmp.lt.u32.totalorder %s93_s13, %s227_s0 }
   0x6   :  { %p99_p2 = pnand %p97_p1, %p94_p0 }
   0x8   :  { %102 = shalt.err (!%p99_p2)
}
   0x9   :  { %s103_s18 = scalar_lea.vmem %s16_s10, 256  ;;  %p108_p4 = scmp.lt.s32.totalorder %s16_s10, %s16_s10 }
   0xa   :  { %p104_p3 = scmp.ne.s32.totalorder %s16_s10, %s103_s18  ;;  %p109_p5 = scmp.lt.s32.totalorder %s103_s18, %s103_s18 }
   0xc   :  { %p110_p6 = por %p109_p5, %p108_p4 }
   0xe   :  { %p111_p7 = pnand %p110_p6, %p104_p3 }
  0x10   :  { %114 = shalt.err (!%p111_p7)
}
  0x11   :  { %s166_s19 = smov 128   ;;  %s167_s20 = smov 8  }
  0x12   :  { %21 = dma.hbm_to_vmem [thread:$0]  %s227_s0, 256, %s16_s10, [#allocation3], %s166_s19, %s166_s19, %s167_s20  }
  0x13   :  { %s168_s23 = smov [#allocation5]   ;;  %s115_s27 = scalar_lea.hbm %s228_s1, 16 }
  0x14   :  { %s28_s24 = sshll.u32 %s168_s23, 4  ;;  %p116_p8 = scmp.ne.s32.totalorder %s228_s1, %s115_s27  ;;  %s29_s24 = int_to_ptr.vmem [resolvable:$true] %s28_s24 }
  0x15   :  { %p119_p9 = scmp.lt.u32.totalorder %s115_s27, %s228_s1 }
  0x17   :  { %p121_p10 = pnand %p119_p9, %p116_p8 }
  0x19   :  { %124 = shalt.err (!%p121_p10)
}
  0x1a   :  { %s125_s4 = scalar_lea.vmem %s29_s24, 16  ;;  %s129_s0 = scalar_lea.vmem %s29_s24, 32 }
  0x1b   :  { %p126_p11 = scmp.ne.s32.totalorder %s29_s24, %s125_s4  ;;  %p130_p12 = scmp.lt.s32.totalorder %s29_s24, %s29_s24 }
  0x1c   :  { %p131_p13 = scmp.lt.s32.totalorder %s129_s0, %s125_s4 }
  0x1e   :  { %p132_p0 = por %p131_p13, %p130_p12 }
  0x20   :  { %p133_p1 = pnand %p132_p0, %p126_p11 }
  0x22   :  { %136 = shalt.err (!%p133_p1)
}
  0x23   :  { %31 = dma.hbm_to_vmem [thread:$0]  %s228_s1, 16, %s29_s24, [#allocation6]  }
  0x24   :  { %159 = dma.done.wait [#allocation3], 256  }
  0x25   :  { %160 = vsyncadd [#allocation3], 4294967040 }
  0x26   :  { %161 = dma.done.wait [#allocation6], 16  }
  0x27   :  { %162 = vsyncadd [#allocation6], 4294967280  ;;  %v38_v0 = vld [vmem:[#allocation2] sm:$0xff]  ;;  %v39_v1 = vld [vmem:[#allocation2 + $0x8] sm:$0xff]  ;;  %s169_s1 = smov [#allocation7]  }
  0x28   :  { %v40_v2 = vmul.f32 %v38_v0, %v38_v0  ;;  %v41_v3 = vmul.f32 %v39_v1, %v39_v1  ;;  %v83_v11 = vld [vmem:[#allocation5] ss:$0 sm:$0xff]  ;;  %s70_s7 = sshll.u32 %s169_s1, 4  ;;  %s71_s7 = int_to_ptr.vmem [resolvable:$true] %s70_s7 }
  0x29   :  { %s137_s8 = scalar_lea.vmem %s71_s7, 256  ;;  %p142_p3 = scmp.lt.s32.totalorder %s71_s7, %s71_s7 }
  0x2a   :  { %42 = vadd.xlane.f32.xlu0 %v40_v2  ;;  %p138_p2 = scmp.ne.s32.totalorder %s71_s7, %s137_s8  ;;  %p143_p4 = scmp.lt.s32.totalorder %s137_s8, %s137_s8 }
  0x2c   :  { %p144_p5 = por %p143_p4, %p142_p3 }
  0x2e   :  { %44 = vadd.xlane.f32.xlu0 %v41_v3  ;;  %p145_p6 = pnand %p144_p5, %p138_p2 }
  0xb7   :  { %v43_v4 = vpop.xlane.xlu0 %42 }
  0xb8   :  { %v46_v5 = vmul.f32 0.03125, %v43_v4 }
  0xba   :  { %v48_v6 = vadd.f32 1e-06, %v46_v5 }
  0xbb   :  { %v45_v7 = vpop.xlane.xlu0 %44 }
  0xbc   :  { %89 = vrsqrt.f32 %v48_v6  ;;  %v47_v8 = vmul.f32 0.03125, %v45_v7 }
  0xbe   :  { %v49_v9 = vadd.f32 1e-06, %v47_v8 }
  0xc0   :  { %91 = vrsqrt.f32 %v49_v9 }
  0xc6   :  { %v90_v10 = vpop.eup %89 }
  0xc7   :  { %v53_v12 = vmul.f32 %v90_v10, %v38_v0 }
  0xc9   :  { %v61_v13 = vmul.f32 %v83_v11, %v53_v12 }
  0xca   :  { %v92_v14 = vpop.eup %91 }
  0xcb   :  { %v54_v15 = vmul.f32 %v92_v14, %v39_v1  ;;  %63 = vst [vmem:[#allocation7] sm:$0xff] %v61_v13 }
  0xcd   :  { %v62_v16 = vmul.f32 %v83_v11, %v54_v15 }
  0xcf   :  { %64 = vst [vmem:[#allocation7 + $0x8] sm:$0xff] %v62_v16 }
  0xd0   :  { %148 = shalt.err (!%p145_p6)
}
  0xd1   :  { %s149_s11 = scalar_lea.hbm %s229_s2, 256 }
  0xd2   :  { %p150_p7 = scmp.ne.s32.totalorder %s229_s2, %s149_s11  ;;  %p153_p8 = scmp.lt.u32.totalorder %s149_s11, %s229_s2 }
  0xd4   :  { %p155_p9 = pnand %p153_p8, %p150_p7 }
  0xd6   :  { %158 = shalt.err (!%p155_p9)
}
  0xd7   :  { %76 = dma.vmem_to_hbm [thread:$0]  %s71_s7, 256, %s229_s2, [#allocation4], %s166_s19, %s166_s19, %s167_s20  }
  0xd8   :  { %163 = dma.done.wait [#allocation4], 256  }
  0xd9   :  { %164 = vsyncadd [#allocation4], 4294967040 }
  0xda   :  { %80 = vsyncpa [#allocation3], 1 }
  0xdb   :  { %81 = vsyncpa [#allocation6], 1 }
  0xdc   :  { %82 = vsyncpa [#allocation4], 1 }

</bundles_post_ra>
